<compile_context>
chip_gen: v5e
topology: v5e:2x2
jax: 0.10.0
libtpu: 0.0.40
codegen_flags: <defaults>
</compile_context>

<pallas_src>
import jax
import jax.numpy as jnp
from jax.experimental import pallas as pl
from jax.experimental.pallas import tpu as pltpu


# ----------------------------------------------------------------------------
# Kernel
# ----------------------------------------------------------------------------
def _make_fused_heads_kernel(hw_chunk):
    """x_ref: (TB, C, HW)  (bf16 or f32, channels on sublanes, spatial on lanes)
       w_ref: (C, Npad)    bf16 fused head weight (zero-padded to 128 lanes)
       b_ref: (1, Npad)    f32 fused bias
       o_ref: (TB, Npad)   f32 logits (lane-dense, unmasked stores)."""

    def kernel(x_ref, w_ref, b_ref, o_ref):
        TB, C, HW = x_ref.shape
        inv_hw = 1.0 / HW                             # static python float

        # Chunked f32 accumulation of the spatial mean: avoids materializing a
        # full-block f32 copy of the feature tile (only a (TB, C, hw_chunk)
        # f32 slab is live at a time).
        acc = jnp.zeros((TB, C), jnp.float32)
        start = 0
        while start < HW:                             # static unrolled loop
            size = min(hw_chunk, HW - start)
            slab = x_ref[:, :, pl.ds(start, size)].astype(jnp.float32)
            acc = acc + jnp.sum(slab, axis=-1)        # XLU cross-lane reduce
            start += size

        pooled = (acc * inv_hw).astype(w_ref.dtype)   # bf16 for the MXU
        o_ref[...] = (
            jnp.dot(pooled, w_ref[...], preferred_element_type=jnp.float32)
            + b_ref[...]                              # f32 bias, VPU add
        )

    return kernel


# ----------------------------------------------------------------------------
# Sizing helpers
# ----------------------------------------------------------------------------
def _round_up(x, m):
    return ((x + m - 1) // m) * m


def _vmem_limits():
    """(scoped_vmem_limit_bytes, planning_budget_bytes) derived from the chip.
    v5e/v6e: 128 MiB physical -> grant 96 MiB;  v7x: 64 MiB -> grant 48 MiB."""
    cap = None
    try:
        cap = getattr(pltpu.get_tpu_info(), "vmem_capacity_bytes", None)
    except Exception:  # e.g. CPU interpret mode
        cap = None
    if cap is None:
        cap = 64 << 20                     # conservative (v7x physical)
    scoped = min(int(cap * 0.75), 96 << 20)
    budget = int(scoped * 0.8)             # headroom for compiler scratch
    return scoped, budget


def _choose_batch_tile(B, HW, C, n_pad, x_itemsize, w_itemsize, budget_bytes):
    """Largest batch tile whose TOTAL per-step VMEM footprint fits the budget:
    2x double-buffered x block + f32 pooled accumulator + 2x output block +
    resident fused weight/bias."""
    fixed = C * n_pad * w_itemsize + n_pad * 4            # resident w + b
    per_row = (2 * C * HW * x_itemsize                     # 2x input buffers
               + 2 * n_pad * 4                             # 2x output buffers
               + C * 4)                                    # f32 accumulator
    tb = (budget_bytes - fixed) // max(1, per_row)

    if B <= 8:
        # Single block covering the whole (small) batch: the 2-D output block's
        # second-to-last dim equals the full array dim, so layout rules hold.
        return B

    # Guard: the 8-row floor is the smallest legal tile for the 2-D output
    # block; on extreme (HW*C) it may still exceed the budget (documented).
    tb = max(8, (tb // 8) * 8)
    # Ensure grid length >= 2 so "parallel" can shard across v7x's 2 TCs.
    tb = min(tb, _round_up(-(-B // 2), 8))
    tb = min(tb, _round_up(B, 8))
    return int(tb)


def _choose_hw_chunk(tb, C, HW, temp_budget_bytes=2 << 20):
    """Chunk length along HW so the per-chunk f32 slab stays ~<= 2 MiB."""
    chunk = max(8, temp_budget_bytes // max(1, tb * C * 4))
    if chunk >= HW:
        return HW
    if chunk >= 128:
        chunk = (chunk // 128) * 128       # lane-aligned slabs
    return int(chunk)


# ----------------------------------------------------------------------------
# Parameter fusion (hoisted out of the per-call path — build ONCE)
# ----------------------------------------------------------------------------
def fuse_head_params(params, weight_dtype=jnp.bfloat16):
    wc, bc = params["color"]
    wg, bg = params["gender"]
    wa, ba = params["article"]
    splits = (wc.shape[1], wg.shape[1], wa.shape[1])
    n_tot = sum(splits)
    n_pad = max(128, _round_up(n_tot, 128))          # lane-dense fused head
    C = wc.shape[0]

    w_fused = jnp.zeros((C, n_pad), weight_dtype)
    w_fused = w_fused.at[:, :n_tot].set(
        jnp.concatenate([wc, wg, wa], axis=1).astype(weight_dtype))
    b_fused = jnp.zeros((1, n_pad), jnp.float32)
    b_fused = b_fused.at[:, :n_tot].set(
        jnp.concatenate([bc, bg, ba], axis=1).astype(jnp.float32))
    return w_fused, b_fused, splits


# ----------------------------------------------------------------------------
# Forward
# ----------------------------------------------------------------------------
def multilabel_forward(x_nchw, w_fused, b_fused, splits):
    """x_nchw: (B, C, H, W) feature map (output of base_model), ideally bf16.
    Returns dict with 'color', 'gender', 'article' logits."""
    B, C, H, W = x_nchw.shape
    HW = H * W
    n_pad = w_fused.shape[1]

    # FREE reshape (contiguous): no transpose, no extra HBM pass.
    x = x_nchw.reshape(B, C, HW)

    scoped_vmem, budget = _vmem_limits()
    tb = _choose_batch_tile(B, HW, C, n_pad,
                            x.dtype.itemsize, w_fused.dtype.itemsize, budget)
    grid = (pl.cdiv(B, tb),)
    hw_chunk = _choose_hw_chunk(tb, C, HW)

    cost = pl.CostEstimate(
        flops=2 * B * C * n_pad + B * HW * C,
        transcendentals=0,
        bytes_accessed=(x.size * x.dtype.itemsize
                        + w_fused.size * w_fused.dtype.itemsize
                        + b_fused.size * 4 + B * n_pad * 4),
    )

    out = pl.pallas_call(
        _make_fused_heads_kernel(hw_chunk),
        out_shape=jax.ShapeDtypeStruct((B, n_pad), jnp.float32),
        grid=grid,
        in_specs=[
            # Batch-tiled NCHW features; last two dims full-extent.
            pl.BlockSpec((tb, C, HW), lambda i: (i, 0, 0)),
            # Grid-invariant weight/bias: DMA'd once, stay resident in VMEM.
            pl.BlockSpec((C, n_pad), lambda i: (0, 0)),
            pl.BlockSpec((1, n_pad), lambda i: (0, 0)),
        ],
        out_specs=pl.BlockSpec((tb, n_pad), lambda i: (i, 0)),
        compiler_params=pltpu.CompilerParams(
            dimension_semantics=("parallel",),        # megacore-shardable
            vmem_limit_bytes=scoped_vmem),
        cost_estimate=cost,
    )(x, w_fused, b_fused)

    nc, ng, na = splits
    return {
        "color": out[:, :nc],
        "gender": out[:, nc:nc + ng],
        "article": out[:, nc + ng:nc + ng + na],
    }


def init_params(key, last_channel, n_color, n_gender, n_article):
    """Deterministic nn.Linear-style init. Weights stored as (in, out) =
    transpose of PyTorch's (out, in), so the kernel does pooled @ W."""
    ks = jax.random.split(key, 6)

    def linear(kw, kb, n_out):
        bound = 1.0 / jnp.sqrt(last_channel)
        w = jax.random.uniform(kw, (last_channel, n_out), jnp.float32, -bound, bound)
        b = jax.random.uniform(kb, (1, n_out), jnp.float32, -bound, bound)
        return w, b

    return {
        "color": linear(ks[0], ks[1], n_color),
        "gender": linear(ks[2], ks[3], n_gender),
        "article": linear(ks[4], ks[5], n_article),
    }


# ----------------------------------------------------------------------------
# Test
# ----------------------------------------------------------------------------
if __name__ == "__main__":
    # Small synthetic shapes: B=2, last_channel=32, spatial 16x16,
    # n_color=8, n_gender=4, n_article=16.
    B, C, H, W = 2, 32, 16, 16
    n_color, n_gender, n_article = 8, 4, 16

    root = jax.random.PRNGKey(0)
    kx, kp = jax.random.split(root)

    # Backbone NCHW features, already in bf16 (so the wrapper does no cast and
    # the kernel streams the minimum HBM bytes).
    x = jax.random.normal(kx, (B, C, H, W), jnp.float32).astype(jnp.bfloat16)

    params = init_params(kp, C, n_color, n_gender, n_article)
    # Fusion / zero-padding of the three heads happens ONCE, not per call.
    w_fused, b_fused, splits = fuse_head_params(params)

    out = multilabel_forward(x, w_fused, b_fused, splits)
    jax.block_until_ready(out)

    # Plain-JAX reference with the same bf16 features / bf16 weights / f32 acc.
    xf = x.astype(jnp.float32)
    pooled_ref = jnp.mean(xf.reshape(B, C, H * W), axis=-1)
    pooled_bf = pooled_ref.astype(jnp.bfloat16).astype(jnp.float32)

    def ref_head(name):
        w, b = params[name]
        w_bf = w.astype(jnp.bfloat16).astype(jnp.float32)
        return pooled_bf @ w_bf + b[0]

    ref = {k: ref_head(k) for k in ("color", "gender", "article")}
    for k in ("color", "gender", "article"):
        assert out[k].shape == ref[k].shape, k
        assert jnp.allclose(out[k], ref[k], atol=5e-3, rtol=5e-2), k

    print("KERNEL_OK")
</pallas_src>

<mosaic_0001>
module attributes {stable_mosaic.version = 11 : i64} {
  func.func @kernel(%arg0: i32, %arg1: memref<2x32x256xbf16, #tpu.memory_space<vmem>>, %arg2: memref<32x128xbf16, #tpu.memory_space<vmem>>, %arg3: memref<1x128xf32, #tpu.memory_space<vmem>>, %arg4: memref<2x128xf32, #tpu.memory_space<vmem>>) attributes {dimension_semantics = [#tpu.dimension_semantics<parallel>], iteration_bounds = array<i64: 1>, scalar_prefetch = 0 : i64, scratch_operands = 0 : i64, tpu.core_type = #tpu.core_type<tc>, window_params = [{transform_indices = @transform_0, window_bounds = array<i64: 2, 32, 256>}, {pipeline_mode = #tpu.pipeline_mode<synchronous>, transform_indices = @transform_1, window_bounds = array<i64: 32, 128>}, {pipeline_mode = #tpu.pipeline_mode<synchronous>, transform_indices = @transform_2, window_bounds = array<i64: 1, 128>}, {transform_indices = @transform_3, window_bounds = array<i64: 2, 128>}]} {
    %cst = arith.constant 0.000000e+00 : f32
    %0 = vector.broadcast %cst : f32 to vector<2x32xf32>
    %c0 = arith.constant 0 : index
    %c0_0 = arith.constant 0 : index
    %c0_1 = arith.constant 0 : index
    %1 = vector.load %arg1[%c0, %c0_0, %c0_1] : memref<2x32x256xbf16, #tpu.memory_space<vmem>>, vector<2x32x256xbf16>
    %2 = arith.extf %1 : vector<2x32x256xbf16> to vector<2x32x256xf32>
    %cst_2 = arith.constant dense<0.000000e+00> : vector<2x32xf32>
    %3 = vector.multi_reduction <add>, %2, %cst_2 [2] : vector<2x32x256xf32> to vector<2x32xf32>
    %4 = arith.addf %0, %3 : vector<2x32xf32>
    %cst_3 = arith.constant 3.906250e-03 : f32
    %5 = vector.broadcast %cst_3 : f32 to vector<2x32xf32>
    %6 = arith.mulf %4, %5 : vector<2x32xf32>
    %7 = arith.truncf %6 : vector<2x32xf32> to vector<2x32xbf16>
    %c0_4 = arith.constant 0 : index
    %c0_5 = arith.constant 0 : index
    %8 = vector.load %arg2[%c0_4, %c0_5] : memref<32x128xbf16, #tpu.memory_space<vmem>>, vector<32x128xbf16>
    %cst_6 = arith.constant dense<0.000000e+00> : vector<2x128xf32>
    %9 = tpu.matmul %7, %8, %cst_6 {dimension_numbers = #tpu.dot_dimension_numbers<[1], [0], [0], [1], [0, 0, 1, 1], [], []>} : vector<2x32xbf16>, vector<32x128xbf16>, vector<2x128xf32> -> vector<2x128xf32>
    %c0_7 = arith.constant 0 : index
    %c0_8 = arith.constant 0 : index
    %10 = vector.load %arg3[%c0_7, %c0_8] : memref<1x128xf32, #tpu.memory_space<vmem>>, vector<1x128xf32>
    %11 = vector.broadcast %10 : vector<1x128xf32> to vector<2x128xf32>
    %12 = arith.addf %9, %11 : vector<2x128xf32>
    %c0_9 = arith.constant 0 : index
    %c0_10 = arith.constant 0 : index
    %13 = vector.load %arg4[%c0_9, %c0_10] : memref<2x128xf32, #tpu.memory_space<vmem>>, vector<2x128xf32>
    tpu.vector_store %arg4[%c0_9, %c0_10], %12 {strides = array<i32>} : memref<2x128xf32, #tpu.memory_space<vmem>>, vector<2x128xf32>,
    return
  }
  func.func @transform_0(%arg0: i32) -> (i32, i32, i32) {
    %c0_i32 = arith.constant 0 : i32
    %c0_i32_0 = arith.constant 0 : i32
    %c0_i32_1 = arith.constant 0 : i32
    return %arg0, %c0_i32, %c0_i32_0 : i32, i32, i32
  }
  func.func @transform_1(%arg0: i32) -> (i32, i32) {
    %c0_i32 = arith.constant 0 : i32
    %c0_i32_0 = arith.constant 0 : i32
    %c0_i32_1 = arith.constant 0 : i32
    return %c0_i32, %c0_i32_0 : i32, i32
  }
  func.func @transform_2(%arg0: i32) -> (i32, i32) {
    %c0_i32 = arith.constant 0 : i32
    %c0_i32_0 = arith.constant 0 : i32
    %c0_i32_1 = arith.constant 0 : i32
    return %c0_i32, %c0_i32_0 : i32, i32
  }
  func.func @transform_3(%arg0: i32) -> (i32, i32) {
    %c0_i32 = arith.constant 0 : i32
    %c0_i32_0 = arith.constant 0 : i32
    return %arg0, %c0_i32 : i32, i32
  }
}

</mosaic_0001>

<bundles_post_ra>
// kernel: tpu_custom_call.1
= control target key start
LH: loop header
LB: loop body
LE: loop exit
PB: predicated region body
PF: predicated region fallthrough
CT: control target
= control target key end

     0   :  { %8 = vsyncpa [#allocation3], 0  ;;  %s347_s0 = inlined_call_operand.hbm [shape: bf16[2,32,256], index: 0, kind: input, shape index: {}]   ;;  %s348_s1 = inlined_call_operand.hbm [shape: bf16[32,128], index: 1, kind: input, shape index: {}]   ;;  %s349_s2 = inlined_call_operand.vmem [shape: f32[1,128], index: 2, kind: input, shape index: {}]   ;;  %s350_s3 = inlined_call_operand.hbm [shape: f32[2,128], index: 3, kind: output, shape index: {}]  }
   0x1   :  { %9 = vsyncpa [#allocation6], 0 }
   0x2   :  { %10 = vsyncpa [#allocation4], 0  ;;  %s15_s14 = sshll.u32 %s347_s0, 4  ;;  %s306_s15 = smov [#allocation2]   ;;  %s16_s14 = int_to_ptr.hbm [resolvable:$true] %s15_s14 }
   0x3   :  { %s17_s16 = sshll.u32 %s306_s15, 4  ;;  %s28_s19 = sshll.u32 %s348_s1, 4  ;;  %s18_s16 = int_to_ptr.vmem [resolvable:$true] %s17_s16  ;;  %s29_s19 = int_to_ptr.hbm [resolvable:$true] %s28_s19 }
   0x4   :  { %s307_s20 = smov 128   ;;  %s308_s21 = smov 8  }
   0x5   :  { %23 = dma.hbm_to_vmem [thread:$0]  %s16_s14, 1024, %s18_s16, [#allocation3], %s307_s20, %s307_s20, %s308_s21  }
   0x6   :  { %s309_s22 = smov [#allocation5]   ;;  %s310_s24 = smov 64  }
   0x7   :  { %s30_s23 = sshll.u32 %s309_s22, 4  ;;  %s311_s25 = smov 4   ;;  %s31_s23 = int_to_ptr.vmem [resolvable:$true] %s30_s23 }
   0x8   :  { %36 = dma.hbm_to_vmem [thread:$0]  %s29_s19, 256, %s31_s23, [#allocation6], %s310_s24, %s310_s24, %s311_s25  }
   0x9   :  { %300 = dma.done.wait [#allocation3], 1024  }
   0xa   :  { %301 = vsyncadd [#allocation3], 4294966272 }
   0xb   :  { %302 = dma.done.wait [#allocation6], 256  }
   0xc   :  { %303 = vsyncadd [#allocation6], 4294967040  ;;  %v52_v0 = vld [vmem:[#allocation2 + $0x20] sm:$0xff]  ;;  %v50_v1 = vld [vmem:[#allocation2 + $0x10] sm:$0xff]  ;;  %v136_v37 = vlaneseq  ;;  %vm141_vm0 = vcmask 130112   ;;  %vm145_vm1 = vcmask 195712  }
   0xd   :  { %v48_v2 = vld [vmem:[#allocation2] sm:$0xff]  ;;  %v64_v3 = vunpack.c.l.bf16 %v52_v0  ;;  %v65_v4 = vunpack.c.h.bf16 %v52_v0  ;;  %v60_v5 = vunpack.c.l.bf16 %v50_v1  ;;  %v61_v6 = vunpack.c.h.bf16 %v50_v1  ;;  %v53_v9 = vld [vmem:[#allocation2 + $0x28] sm:$0xff]  ;;  %v51_v10 = vld [vmem:[#allocation2 + $0x18] sm:$0xff]  ;;  %s312_s26 = smov [#allocation7]   ;;  %s198_s30 = sshll.u32 %s350_s3, 4  ;;  %s199_s30 = int_to_ptr.hbm [resolvable:$true] %s198_s30 }
   0xe   :  { %v56_v7 = vunpack.c.l.bf16 %v48_v2  ;;  %v57_v8 = vunpack.c.h.bf16 %v48_v2  ;;  %v49_v13 = vld [vmem:[#allocation2 + $0x8] sm:$0xff]  ;;  %v66_v15 = vunpack.c.l.bf16 %v53_v9  ;;  %v67_v16 = vunpack.c.h.bf16 %v53_v9  ;;  %v55_v24 = vld [vmem:[#allocation2 + $0x38] sm:$0xff]  ;;  %v54_v25 = vld [vmem:[#allocation2 + $0x30] sm:$0xff]  ;;  %s196_s27 = sshll.u32 %s312_s26, 4  ;;  %s197_s27 = int_to_ptr.vmem [resolvable:$true] %s196_s27 }
   0xf   :  { %v84_v11 = vadd.f32 %v65_v4, %v64_v3  ;;  %v78_v12 = vadd.f32 %v61_v6, %v60_v5  ;;  %v62_v17 = vunpack.c.l.bf16 %v51_v10  ;;  %v63_v18 = vunpack.c.h.bf16 %v51_v10  ;;  %v219_v32 = vld [vmem:[#allocation5 + $0x8] sm:$0xff]  ;;  %v218_v33 = vld [vmem:[#allocation5] sm:$0xff] }
  0x10   :  { %v72_v14 = vadd.f32 %v57_v8, %v56_v7  ;;  %v58_v19 = vunpack.c.l.bf16 %v49_v13  ;;  %v59_v20 = vunpack.c.h.bf16 %v49_v13  ;;  %v87_v21 = vadd.f32 %v67_v16, %v66_v15  ;;  %183 = vmatpush.bf16.msra.mxu0 %v219_v32 }
  0x11   :  { %85 = vadd.xlane.f32.xlu1 %v84_v11  ;;  %79 = vadd.xlane.f32.xlu2 %v78_v12  ;;  %v81_v22 = vadd.f32 %v63_v18, %v62_v17  ;;  %v70_v26 = vunpack.c.l.bf16 %v55_v24  ;;  %v71_v27 = vunpack.c.h.bf16 %v55_v24  ;;  %v68_v28 = vunpack.c.l.bf16 %v54_v25 }
  0x12   :  { %73 = vadd.xlane.f32.xlu0 %v72_v14  ;;  %v75_v23 = vadd.f32 %v59_v20, %v58_v19  ;;  %v69_v29 = vunpack.c.h.bf16 %v54_v25  ;;  %v137_v41 = vand.u32 127, %v136_v37  ;;  %vm149_vm2 = vcmask 261312   ;;  %v227_v19 = vld [vmem:[%s349_s2] ss:$0 sm:$0xff] }
  0x13   :  { %v93_v30 = vadd.f32 %v71_v27, %v70_v26  ;;  %vm158_vm3 = vcmask 1041409   ;;  %vm173_vm4 = vcmask 261120  }
  0x14   :  { %v90_v31 = vadd.f32 %v69_v29, %v68_v28  ;;  %184 = vmatpush.bf16.msra.mxu0 %v218_v33  ;;  %v139_v51 = vadd.s32 4294967288, %v137_v41  ;;  %v143_v55 = vadd.s32 4294967280, %v137_v41  ;;  %v147_v0 = vadd.s32 4294967272, %v137_v41 }
  0x19   :  { %88 = vadd.xlane.f32.xlu1 %v87_v21  ;;  %82 = vadd.xlane.f32.xlu2 %v81_v22 }
  0x1a   :  { %76 = vadd.xlane.f32.xlu0 %v75_v23 }
  0x21   :  { %94 = vadd.xlane.f32.xlu1 %v93_v30 }
  0x22   :  { %91 = vadd.xlane.f32.xlu0 %v90_v31 }
  0x84   :  { %v86_v34 = vpop.xlane.xlu1 %85  ;;  %v80_v35 = vpop.xlane.xlu2 %79 }
  0x85   :  { %v74_v36 = vpop.xlane.xlu0 %73  ;;  %v106_v38 = vmul.f32 0.00390625, %v80_v35  ;;  %v108_v45 = vmul.f32 0.00390625, %v86_v34 }
  0x86   :  { %v104_v46 = vmul.f32 0.00390625, %v74_v36 }
  0x8c   :  { %v89_v39 = vpop.xlane.xlu1 %88  ;;  %v83_v40 = vpop.xlane.xlu2 %82 }
  0x8d   :  { %v109_v42 = vmul.f32 0.00390625, %v89_v39  ;;  %v107_v43 = vmul.f32 0.00390625, %v83_v40  ;;  %v77_v44 = vpop.xlane.xlu0 %76 }
  0x8e   :  { %v105_v47 = vmul.f32 0.00390625, %v77_v44 }
  0x8f   :  { %v114_v48 = vpack.c.bf16 %v109_v42, %v108_v45  ;;  %v113_v49 = vpack.c.bf16 %v107_v43, %v106_v38 }
  0x90   :  { %v112_v50 = vpack.c.bf16 %v105_v47, %v104_v46 }
  0x91   :  { %v132_v54 = vunpack.c.l.b16 %v114_v48  ;;  %v130_v56 = vunpack.c.l.b16 %v113_v49  ;;  %v133_v58 = vunpack.c.h.b16 %v114_v48  ;;  %v131_v5 = vunpack.c.h.b16 %v113_v49 }
  0x92   :  { %v128_v52 = vunpack.c.l.b16 %v112_v50  ;;  %v129_v53 = vunpack.c.h.b16 %v112_v50 }
  0x93   :  { %v144_v1 = vperm.slane %v130_v56, %v143_v55  ;;  %v151_v3 = vperm.slane %v132_v54, %v137_v41  ;;  %v152_v4 = vperm.slane %v133_v58, %v139_v51  ;;  %v148_v12 = vperm.slane %v131_v5, %v147_v0 }
  0x94   :  { %v95_v57 = vpop.xlane.xlu1 %94  ;;  %v138_v59 = vperm.slane %v128_v52, %v137_v41  ;;  %v140_v60 = vperm.slane %v129_v53, %v139_v51 }
  0x95   :  { %v111_v61 = vmul.f32 0.00390625, %v95_v57  ;;  %v92_v62 = vpop.xlane.xlu0 %91  ;;  %v153_v13 = vsel %vm141_vm0, %v152_v4, %v151_v3 }
  0x96   :  { %v110_v63 = vmul.f32 0.00390625, %v92_v62  ;;  %v142_v6 = vsel %vm141_vm0, %v140_v60, %v138_v59 }
  0x97   :  { %v146_v11 = vsel %vm145_vm1, %v144_v1, %v142_v6 }
  0x98   :  { %v115_v2 = vpack.c.bf16 %v111_v61, %v110_v63  ;;  %v150_v15 = vsel %vm149_vm2, %v148_v12, %v146_v11 }
  0x9a   :  { %v134_v7 = vunpack.c.l.b16 %v115_v2  ;;  %v135_v8 = vunpack.c.h.b16 %v115_v2 }
  0x9c   :  { %v154_v9 = vperm.slane %v134_v7, %v143_v55  ;;  %v156_v10 = vperm.slane %v135_v8, %v147_v0 }
  0x9e   :  { %v155_v14 = vsel %vm145_vm1, %v154_v9, %v153_v13 }
  0x9f   :  { %v157_v16 = vsel %vm149_vm2, %v156_v10, %v155_v14 }
  0xa0   :  { %v159_v17 = vsel %vm158_vm3, %v157_v16, %v150_v15 }
  0xa1   :  { %v160_v18 = vpack.c.b16 %v159_v17, %v159_v17 }
  0xa3   :  { %217 = vmatmul.msk.bf16.vlgmr.msra.gmra.mxu0 %vm173_vm4, %v160_v18 }
 0x120   :  { %v186_v20 = vpop.f32.mrf.mxu0 }
 0x121   :  { %v187_v21 = vadd.f32 %v227_v19, %v186_v20 }
 0x123   :  { %190 = vst [vmem:[#allocation7] sm:$0x3] %v187_v21 }
 0x124   :  { %201 = dma.vmem_to_hbm [thread:$0]  %s197_s27, 32, %s199_s30, [#allocation4]  }
 0x128   :  { %v188_v22 = vpop.f32.mrf.mxu0 }
 0x129   :  { %304 = dma.done.wait [#allocation4], 32  }
 0x12a   :  { %305 = vsyncadd [#allocation4], 4294967264 }
 0x12b   :  { %206 = vsyncpa [#allocation3], 1 }
 0x12c   :  { %207 = vsyncpa [#allocation6], 1 }
 0x12d   :  { %208 = vsyncpa [#allocation4], 1 }

</bundles_post_ra>
